<compile_context>
chip_gen: v5e
topology: v5e:2x2
jax: 0.10.0
libtpu: 0.0.40
codegen_flags: <defaults>
</compile_context>

<pallas_src>
import math

import numpy as np
import jax
import jax.numpy as jnp
from jax.experimental import pallas as pl
from jax.experimental.pallas import tpu as pltpu


# ------------------------------- helpers ------------------------------------

def _round_up(x, m):
    return ((x + m - 1) // m) * m


def _full_spec(shape):
    nd = len(shape)
    return pl.BlockSpec(shape, lambda *_, nd=nd: (0,) * nd)


def _vmem_budget(inputs, out_shape, scratch_bytes):
    def nbytes(a):
        return int(math.prod(a.shape)) * a.dtype.itemsize
    need = 2 * sum(nbytes(a) for a in inputs) + 2 * nbytes(out_shape) + scratch_bytes
    return int(min(128 << 20, max(32 << 20, need + (4 << 20))))


# --------------------------- shared head math --------------------------------
# fc(Linear+ReLU) -> LayerNorm (biased var, eps=1e-5, masked to the real H
# lanes) -> output Linear.  All weights are Hp/Pp lane-padded with zeros, so
# padded lanes of every intermediate stay exactly 0.

def _head_math(z_in, H, fc_w, fc_b, ln_g, ln_b, out_w, out_b):
    z = jnp.dot(z_in.astype(jnp.bfloat16), fc_w,
                preferred_element_type=jnp.float32) + fc_b
    z = jnp.maximum(z, 0.0)
    inv_h = 1.0 / float(H)
    mean = jnp.sum(z, axis=-1, keepdims=True) * inv_h
    lane = jax.lax.broadcasted_iota(jnp.int32, z.shape, 1)
    diff = jnp.where(lane < H, z - mean, 0.0)
    var = jnp.sum(diff * diff, axis=-1, keepdims=True) * inv_h
    zn = diff * jax.lax.rsqrt(var + 1e-5) * ln_g + ln_b
    return jnp.dot(zn.astype(jnp.bfloat16), out_w,
                   preferred_element_type=jnp.float32) + out_b


# ------------------------------ Pallas kernels -------------------------------

def make_head_only_kernel(H):
    """Fast path: all surviving rows come from the control branch, so the LSTM
    stack is dead work (faithful: the reference also discards those rows)."""

    def kernel(xs_ref, cw_ref, cb_ref, fw_ref, fb_ref, g_ref, b_ref,
               ow_ref, ob_ref, out_ref):
        z = jnp.dot(xs_ref[...].astype(jnp.bfloat16), cw_ref[...],
                    preferred_element_type=jnp.float32) + cb_ref[...]
        out_ref[...] = _head_math(z, H, fw_ref[...], fb_ref[...],
                                  g_ref[...], b_ref[...],
                                  ow_ref[...], ob_ref[...])

    return kernel


def make_lstm_kernel(depth, T_run, lstm_lo, n_lstm, n_ctrl, H, Hp):
    """General path: multi-layer LSTM (run only through the last needed step)
    + control linear on the needed rows + fused head."""
    has_ctrl = n_ctrl > 0

    def kernel(*refs):
        idx = 0
        xp_ref = refs[idx]; idx += 1                    # (T_run, Bp, F0)
        xc_ref = None
        if has_ctrl:
            xc_ref = refs[idx]; idx += 1                # (n_ctrl, Bp, C)
        lstm_refs = refs[idx:idx + 3 * depth]; idx += 3 * depth
        if has_ctrl:
            cw_ref, cb_ref = refs[idx], refs[idx + 1]; idx += 2
        fw_ref, fb_ref, g_ref, b_ref, ow_ref, ob_ref = refs[idx:idx + 6]; idx += 6
        out_ref = refs[idx]                             # (n_sel*Bp, Pp)
        seq_scr = refs[idx + 1]                         # (T_run, Bp, Hp)
        xw_scr = refs[idx + 2]                          # (T_run, Bp, 4Hp)

        Bp = xp_ref.shape[1]
        F0 = xp_ref.shape[2]

        # ---------------- multi-layer LSTM (unrolled, lane-aligned) ----------------
        for layer in range(depth):
            w_ih = lstm_refs[3 * layer][...]            # (F_l, 4Hp) bf16
            w_hh = lstm_refs[3 * layer + 1][...]        # (Hp,  4Hp) bf16
            bias = lstm_refs[3 * layer + 2][...]        # (1,   4Hp) f32

            if layer == 0:
                layer_in = xp_ref[...].reshape(T_run * Bp, F0)
            else:
                layer_in = seq_scr[...].reshape(T_run * Bp, Hp)

            # Hoisted input projection; parked in VMEM scratch to bound live ranges.
            xw = jnp.dot(layer_in.astype(jnp.bfloat16), w_ih,
                         preferred_element_type=jnp.float32) + bias
            xw_scr[...] = xw.reshape(T_run, Bp, 4 * Hp)

            h = jnp.zeros((Bp, Hp), jnp.float32)
            c = jnp.zeros((Bp, Hp), jnp.float32)
            for t in range(T_run):
                gates = jnp.dot(h.astype(jnp.bfloat16), w_hh,
                                preferred_element_type=jnp.float32) + xw_scr[t]
                i_g = jax.nn.sigmoid(gates[:, 0 * Hp:1 * Hp])
                f_g = jax.nn.sigmoid(gates[:, 1 * Hp:2 * Hp])
                g_g = jnp.tanh(gates[:, 2 * Hp:3 * Hp])
                o_g = jax.nn.sigmoid(gates[:, 3 * Hp:4 * Hp])
                c = f_g * c + i_g * g_g
                h = o_g * jnp.tanh(c)
                seq_scr[t] = h                          # full (8,128)-aligned store
            # TODO(synk): keep w_hh staged in the MXU across the time loop
            # (pltpu.matmul_push_rhs / matmul_acc_lhs / matmul_pop).

        # ------------- gather surviving rows (contiguous slabs only) -------------
        slabs = [seq_scr[pl.ds(lstm_lo, n_lstm)].reshape(n_lstm * Bp, Hp)]
        if has_ctrl:
            xcf = xc_ref[...].reshape(n_ctrl * Bp, xc_ref.shape[2])
            ctrl_out = jnp.dot(xcf.astype(jnp.bfloat16), cw_ref[...],
                               preferred_element_type=jnp.float32) + cb_ref[...]
            slabs.append(ctrl_out)
        z_in = jnp.concatenate(slabs, axis=0) if len(slabs) > 1 else slabs[0]

        out_ref[...] = _head_math(z_in, H, fw_ref[...], fb_ref[...],
                                  g_ref[...], b_ref[...],
                                  ow_ref[...], ob_ref[...])

    return kernel


# ------------------------------ parameters -----------------------------------

def init_params(key, num_control, num_pred, num_all_features, dim, depth):
    """Deterministic parameter init (PyTorch-style uniform bounds)."""
    params = {"lstm": []}
    stdv = 1.0 / math.sqrt(dim)
    keys = jax.random.split(key, 4 * depth + 6)
    ki = 0
    for layer in range(depth):
        in_f = num_all_features if layer == 0 else dim
        w_ih = jax.random.uniform(keys[ki], (4 * dim, in_f), jnp.float32, -stdv, stdv); ki += 1
        w_hh = jax.random.uniform(keys[ki], (4 * dim, dim), jnp.float32, -stdv, stdv); ki += 1
        b_ih = jax.random.uniform(keys[ki], (4 * dim,), jnp.float32, -stdv, stdv); ki += 1
        b_hh = jax.random.uniform(keys[ki], (4 * dim,), jnp.float32, -stdv, stdv); ki += 1
        params["lstm"].append({"w_ih": w_ih, "w_hh": w_hh, "b_ih": b_ih, "b_hh": b_hh})

    def lin_init(k1, k2, out_f, in_f):
        bound = 1.0 / math.sqrt(in_f)
        w = jax.random.uniform(k1, (out_f, in_f), jnp.float32, -bound, bound)
        b = jax.random.uniform(k2, (out_f,), jnp.float32, -bound, bound)
        return w, b

    params["ctrl_w"], params["ctrl_b"] = lin_init(keys[ki], keys[ki + 1], dim, num_control); ki += 2
    params["fc_w"], params["fc_b"] = lin_init(keys[ki], keys[ki + 1], dim, dim); ki += 2
    params["ln_gamma"] = jnp.ones((dim,), jnp.float32)
    params["ln_beta"] = jnp.zeros((dim,), jnp.float32)
    params["out_w"], params["out_b"] = lin_init(keys[ki], keys[ki + 1], num_pred, dim); ki += 2
    return params


def pack_params(params):
    """One-time repacking: transpose, per-gate lane-pad H->Hp, pad P->Pp,
    cast MXU weight operands to bf16.  Called once, outside the jitted fwd."""
    H = params["ln_gamma"].shape[0]
    P = params["out_w"].shape[0]
    Hp = _round_up(H, 128)
    Pp = _round_up(P, 128)
    packed = {"H": H, "P": P, "Hp": Hp, "Pp": Pp,
              "depth": len(params["lstm"]), "lstm": []}

    def pad2(x, rows, cols):
        return jnp.pad(x, ((0, rows - x.shape[0]), (0, cols - x.shape[1])))

    def gate_pad_cols(w_t):  # (F, 4H) -> (F, 4Hp), each gate block lane-padded
        blocks = [pad2(w_t[:, k * H:(k + 1) * H], w_t.shape[0], Hp) for k in range(4)]
        return jnp.concatenate(blocks, axis=1)

    for layer, lp in enumerate(params["lstm"]):
        w_ih_t = jnp.transpose(lp["w_ih"])              # (F_l, 4H)
        w_hh_t = jnp.transpose(lp["w_hh"])              # (H,   4H)
        w_ih_p = gate_pad_cols(w_ih_t)
        if layer > 0:                                   # input of layers>=1 is Hp-wide h
            w_ih_p = jnp.pad(w_ih_p, ((0, Hp - w_ih_p.shape[0]), (0, 0)))
        w_hh_p = jnp.pad(gate_pad_cols(w_hh_t), ((0, Hp - H), (0, 0)))
        b_p = gate_pad_cols((lp["b_ih"] + lp["b_hh"]).reshape(1, -1))
        packed["lstm"].append({
            "w_ih": w_ih_p.astype(jnp.bfloat16),
            "w_hh": w_hh_p.astype(jnp.bfloat16),
            "b": b_p.astype(jnp.float32),
        })

    C = params["ctrl_w"].shape[1]
    packed["ctrl_w"] = pad2(jnp.transpose(params["ctrl_w"]), C, Hp).astype(jnp.bfloat16)
    packed["ctrl_b"] = pad2(params["ctrl_b"].reshape(1, -1), 1, Hp)
    packed["fc_w"] = pad2(jnp.transpose(params["fc_w"]), Hp, Hp).astype(jnp.bfloat16)
    packed["fc_b"] = pad2(params["fc_b"].reshape(1, -1), 1, Hp)
    packed["ln_g"] = pad2(params["ln_gamma"].reshape(1, -1), 1, Hp)
    packed["ln_b"] = pad2(params["ln_beta"].reshape(1, -1), 1, Hp)
    packed["out_w"] = pad2(jnp.transpose(params["out_w"]), Hp, Pp).astype(jnp.bfloat16)
    packed["out_b"] = pad2(params["out_b"].reshape(1, -1), 1, Pp)
    return packed


# ------------------------------- forward -------------------------------------

def lstm_model_forward(packed, x_past, x_control, out_len):
    x_past = x_past.astype(jnp.float32)
    x_control = x_control.astype(jnp.float32)
    B, Tp, F0 = x_past.shape
    _, Tc, C = x_control.shape
    H, Hp, P, Pp = packed["H"], packed["Hp"], packed["P"], packed["Pp"]
    depth = packed["depth"]

    # Static indices (in the concatenated time axis) that survive the final
    # y[:, -(2*out_len):-out_len, :] slice.
    Tt = Tp + Tc
    end = Tt - out_len
    start = max(Tt - 2 * out_len, 0)
    assert 0 < out_len and start < end <= Tt, "invalid out_len for given sequence lengths"
    n_sel = end - start
    n_lstm = max(0, min(end, Tp) - start)      # surviving LSTM rows (contiguous)
    n_ctrl = n_sel - n_lstm                    # surviving control rows (contiguous)
    lstm_lo = start
    ctrl_lo = max(start - Tp, 0)

    head_params = [packed["fc_w"], packed["fc_b"], packed["ln_g"], packed["ln_b"],
                   packed["out_w"], packed["out_b"]]
    sem = pltpu.CompilerParams  # alias for brevity below

    if n_lstm == 0:
        # ---- Fast path: LSTM output is entirely discarded by the final slice. ----
        xs = x_control[:, ctrl_lo:ctrl_lo + n_sel, :].reshape(B * n_sel, C)
        inputs = [xs, packed["ctrl_w"], packed["ctrl_b"]] + head_params
        out_shape = jax.ShapeDtypeStruct((B * n_sel, Pp), jnp.float32)
        y = pl.pallas_call(
            make_head_only_kernel(H),
            out_shape=out_shape,
            grid=(1,),
            in_specs=[_full_spec(a.shape) for a in inputs],
            out_specs=_full_spec(out_shape.shape),
            compiler_params=sem(
                dimension_semantics=("arbitrary",),
                vmem_limit_bytes=_vmem_budget(inputs, out_shape, 0)),
        )(*inputs)
        return y.reshape(B, n_sel, Pp)[:, :, :P]

    # ---- General path: run the recurrence only through the last needed step. ----
    T_run = lstm_lo + n_lstm
    Bp = max(8, _round_up(B, 8))               # sublane-aligned batch inside kernel
    xp_t = jnp.transpose(x_past[:, :T_run, :], (1, 0, 2))        # (T_run, B, F0)
    if Bp != B:
        xp_t = jnp.pad(xp_t, ((0, 0), (0, Bp - B), (0, 0)))
    inputs = [xp_t]
    if n_ctrl > 0:
        xc_t = jnp.transpose(x_control[:, ctrl_lo:ctrl_lo + n_ctrl, :], (1, 0, 2))
        if Bp != B:
            xc_t = jnp.pad(xc_t, ((0, 0), (0, Bp - B), (0, 0)))
        inputs.append(xc_t)
    for lw in packed["lstm"]:
        inputs += [lw["w_ih"], lw["w_hh"], lw["b"]]
    if n_ctrl > 0:
        inputs += [packed["ctrl_w"], packed["ctrl_b"]]
    inputs += head_params

    out_shape = jax.ShapeDtypeStruct((n_sel * Bp, Pp), jnp.float32)
    scratch_shapes = [pltpu.VMEM((T_run, Bp, Hp), jnp.float32),
                      pltpu.VMEM((T_run, Bp, 4 * Hp), jnp.float32)]
    scratch_bytes = (T_run * Bp * Hp + T_run * Bp * 4 * Hp) * 4

    y = pl.pallas_call(
        make_lstm_kernel(depth, T_run, lstm_lo, n_lstm, n_ctrl, H, Hp),
        out_shape=out_shape,
        grid=(1,),
        in_specs=[_full_spec(a.shape) for a in inputs],
        out_specs=_full_spec(out_shape.shape),
        scratch_shapes=scratch_shapes,
        compiler_params=sem(
            dimension_semantics=("arbitrary",),
            vmem_limit_bytes=_vmem_budget(inputs, out_shape, scratch_bytes)),
    )(*inputs)
    return y.reshape(n_sel, Bp, Pp).transpose(1, 0, 2)[:B, :, :P]


# ------------------------- pure-JAX reference (f32) --------------------------

def reference_forward(params, x_past, x_control, out_len):
    x_past = x_past.astype(jnp.float32)
    x_control = x_control.astype(jnp.float32)
    H = params["ln_gamma"].shape[0]
    B, Tp, _ = x_past.shape
    x = x_past
    for lp in params["lstm"]:
        w_ih, w_hh = lp["w_ih"], lp["w_hh"]
        b = lp["b_ih"] + lp["b_hh"]
        h = jnp.zeros((B, H), jnp.float32)
        c = jnp.zeros((B, H), jnp.float32)
        outs = []
        for t in range(Tp):
            gates = x[:, t, :] @ w_ih.T + h @ w_hh.T + b
            i = jax.nn.sigmoid(gates[:, :H])
            f = jax.nn.sigmoid(gates[:, H:2 * H])
            g = jnp.tanh(gates[:, 2 * H:3 * H])
            o = jax.nn.sigmoid(gates[:, 3 * H:])
            c = f * c + i * g
            h = o * jnp.tanh(c)
            outs.append(h)
        x = jnp.stack(outs, axis=1)
    ctrl_out = x_control @ params["ctrl_w"].T + params["ctrl_b"]
    comb = jnp.concatenate([x, ctrl_out], axis=1)
    z = jnp.maximum(comb @ params["fc_w"].T + params["fc_b"], 0.0)
    mean = jnp.mean(z, axis=-1, keepdims=True)
    var = jnp.mean((z - mean) ** 2, axis=-1, keepdims=True)
    zn = (z - mean) / jnp.sqrt(var + 1e-5) * params["ln_gamma"] + params["ln_beta"]
    y = zn @ params["out_w"].T + params["out_b"]
    return y[:, -(out_len * 2):-out_len, :]


# --------------------------------- main --------------------------------------

if __name__ == "__main__":
    B = 2
    T_past = 8
    T_ctrl = 8
    num_all_features = 8
    num_control = 4
    num_pred = 3
    dim = 32
    depth = 2

    key = jax.random.PRNGKey(0)
    k_params, k_past, k_ctrl = jax.random.split(key, 3)
    params = init_params(k_params, num_control, num_pred, num_all_features, dim, depth)
    packed = pack_params(params)

    x_past = jax.random.normal(k_past, (B, T_past, num_all_features), jnp.float32)
    x_control = jax.random.normal(k_ctrl, (B, T_ctrl, num_control), jnp.float32)

    ref_fwd = jax.jit(reference_forward, static_argnums=(3,))

    # out_len=4: surviving rows are all control rows -> LSTM stack is skipped.
    # out_len=6: mixed LSTM + control rows -> full recurrence path exercised.
    for out_len in (4, 6):
        fwd = jax.jit(lambda xp, xc, ol=out_len: lstm_model_forward(packed, xp, xc, ol))
        y = fwd(x_past, x_control)
        jax.block_until_ready(y)
        assert y.shape == (B, out_len, num_pred), y.shape
        y_ref = ref_fwd(params, x_past, x_control, out_len)
        np.testing.assert_allclose(np.asarray(y), np.asarray(y_ref),
                                   rtol=5e-2, atol=5e-2)

    print("KERNEL_OK")
</pallas_src>

<mosaic_0001>
module attributes {stable_mosaic.version = 11 : i64} {
  func.func @kernel(%arg0: i32, %arg1: memref<8x4xf32, #tpu.memory_space<vmem>>, %arg2: memref<4x128xbf16, #tpu.memory_space<vmem>>, %arg3: memref<1x128xf32, #tpu.memory_space<vmem>>, %arg4: memref<128x128xbf16, #tpu.memory_space<vmem>>, %arg5: memref<1x128xf32, #tpu.memory_space<vmem>>, %arg6: memref<1x128xf32, #tpu.memory_space<vmem>>, %arg7: memref<1x128xf32, #tpu.memory_space<vmem>>, %arg8: memref<128x128xbf16, #tpu.memory_space<vmem>>, %arg9: memref<1x128xf32, #tpu.memory_space<vmem>>, %arg10: memref<8x128xf32, #tpu.memory_space<vmem>>) attributes {dimension_semantics = [#tpu.dimension_semantics<arbitrary>], iteration_bounds = array<i64: 1>, scalar_prefetch = 0 : i64, scratch_operands = 0 : i64, tpu.core_type = #tpu.core_type<tc>, window_params = [{pipeline_mode = #tpu.pipeline_mode<synchronous>, transform_indices = @transform_0, window_bounds = array<i64: 8, 4>}, {pipeline_mode = #tpu.pipeline_mode<synchronous>, transform_indices = @transform_1, window_bounds = array<i64: 4, 128>}, {pipeline_mode = #tpu.pipeline_mode<synchronous>, transform_indices = @transform_2, window_bounds = array<i64: 1, 128>}, {pipeline_mode = #tpu.pipeline_mode<synchronous>, transform_indices = @transform_3, window_bounds = array<i64: 128, 128>}, {pipeline_mode = #tpu.pipeline_mode<synchronous>, transform_indices = @transform_4, window_bounds = array<i64: 1, 128>}, {pipeline_mode = #tpu.pipeline_mode<synchronous>, transform_indices = @transform_5, window_bounds = array<i64: 1, 128>}, {pipeline_mode = #tpu.pipeline_mode<synchronous>, transform_indices = @transform_6, window_bounds = array<i64: 1, 128>}, {pipeline_mode = #tpu.pipeline_mode<synchronous>, transform_indices = @transform_7, window_bounds = array<i64: 128, 128>}, {pipeline_mode = #tpu.pipeline_mode<synchronous>, transform_indices = @transform_8, window_bounds = array<i64: 1, 128>}, {pipeline_mode = #tpu.pipeline_mode<synchronous>, transform_indices = @transform_9, window_bounds = array<i64: 8, 128>}]} {
    %c0 = arith.constant 0 : index
    %c0_0 = arith.constant 0 : index
    %0 = vector.load %arg1[%c0, %c0_0] : memref<8x4xf32, #tpu.memory_space<vmem>>, vector<8x4xf32>
    %1 = arith.truncf %0 : vector<8x4xf32> to vector<8x4xbf16>
    %c0_1 = arith.constant 0 : index
    %c0_2 = arith.constant 0 : index
    %2 = vector.load %arg2[%c0_1, %c0_2] : memref<4x128xbf16, #tpu.memory_space<vmem>>, vector<4x128xbf16>
    %cst = arith.constant dense<0.000000e+00> : vector<8x128xf32>
    %3 = tpu.matmul %1, %2, %cst {dimension_numbers = #tpu.dot_dimension_numbers<[1], [0], [0], [1], [0, 0, 1, 1], [], []>} : vector<8x4xbf16>, vector<4x128xbf16>, vector<8x128xf32> -> vector<8x128xf32>
    %c0_3 = arith.constant 0 : index
    %c0_4 = arith.constant 0 : index
    %4 = vector.load %arg3[%c0_3, %c0_4] : memref<1x128xf32, #tpu.memory_space<vmem>>, vector<1x128xf32>
    %5 = vector.broadcast %4 : vector<1x128xf32> to vector<8x128xf32>
    %6 = arith.addf %3, %5 : vector<8x128xf32>
    %c0_5 = arith.constant 0 : index
    %c0_6 = arith.constant 0 : index
    %7 = vector.load %arg4[%c0_5, %c0_6] : memref<128x128xbf16, #tpu.memory_space<vmem>>, vector<128x128xbf16>
    %c0_7 = arith.constant 0 : index
    %c0_8 = arith.constant 0 : index
    %8 = vector.load %arg5[%c0_7, %c0_8] : memref<1x128xf32, #tpu.memory_space<vmem>>, vector<1x128xf32>
    %c0_9 = arith.constant 0 : index
    %c0_10 = arith.constant 0 : index
    %9 = vector.load %arg6[%c0_9, %c0_10] : memref<1x128xf32, #tpu.memory_space<vmem>>, vector<1x128xf32>
    %c0_11 = arith.constant 0 : index
    %c0_12 = arith.constant 0 : index
    %10 = vector.load %arg7[%c0_11, %c0_12] : memref<1x128xf32, #tpu.memory_space<vmem>>, vector<1x128xf32>
    %c0_13 = arith.constant 0 : index
    %c0_14 = arith.constant 0 : index
    %11 = vector.load %arg8[%c0_13, %c0_14] : memref<128x128xbf16, #tpu.memory_space<vmem>>, vector<128x128xbf16>
    %c0_15 = arith.constant 0 : index
    %c0_16 = arith.constant 0 : index
    %12 = vector.load %arg9[%c0_15, %c0_16] : memref<1x128xf32, #tpu.memory_space<vmem>>, vector<1x128xf32>
    %13 = arith.truncf %6 : vector<8x128xf32> to vector<8x128xbf16>
    %cst_17 = arith.constant dense<0.000000e+00> : vector<8x128xf32>
    %14 = tpu.matmul %13, %7, %cst_17 {dimension_numbers = #tpu.dot_dimension_numbers<[1], [0], [0], [1], [0, 0, 1, 1], [], []>} : vector<8x128xbf16>, vector<128x128xbf16>, vector<8x128xf32> -> vector<8x128xf32>
    %15 = vector.broadcast %8 : vector<1x128xf32> to vector<8x128xf32>
    %16 = arith.addf %14, %15 : vector<8x128xf32>
    %cst_18 = arith.constant 0.000000e+00 : f32
    %17 = vector.broadcast %cst_18 : f32 to vector<8x128xf32>
    %18 = arith.maximumf %16, %17 : vector<8x128xf32>
    %cst_19 = arith.constant dense<0.000000e+00> : vector<8xf32>
    %19 = vector.multi_reduction <add>, %18, %cst_19 [1] : vector<8x128xf32> to vector<8xf32>
    %20 = vector.shape_cast %19 : vector<8xf32> to vector<8x1xf32>
    %cst_20 = arith.constant 3.125000e-02 : f32
    %21 = vector.broadcast %cst_20 : f32 to vector<8x1xf32>
    %22 = arith.mulf %20, %21 : vector<8x1xf32>
    %23 = tpu.iota {dimensions = array<i32: 1>} : vector<8x128xi32>
    %c32_i32 = arith.constant 32 : i32
    %24 = vector.broadcast %c32_i32 : i32 to vector<8x128xi32>
    %25 = arith.cmpi slt, %23, %24 : vector<8x128xi32>
    %26 = vector.broadcast %22 : vector<8x1xf32> to vector<8x128xf32>
    %27 = arith.subf %18, %26 : vector<8x128xf32>
    %cst_21 = arith.constant 0.000000e+00 : f32
    %28 = vector.broadcast %cst_21 : f32 to vector<8x128xf32>
    %29 = arith.select %25, %27, %28 : vector<8x128xi1>, vector<8x128xf32>
    %30 = arith.mulf %29, %29 : vector<8x128xf32>
    %cst_22 = arith.constant dense<0.000000e+00> : vector<8xf32>
    %31 = vector.multi_reduction <add>, %30, %cst_22 [1] : vector<8x128xf32> to vector<8xf32>
    %32 = vector.shape_cast %31 : vector<8xf32> to vector<8x1xf32>
    %cst_23 = arith.constant 3.125000e-02 : f32
    %33 = vector.broadcast %cst_23 : f32 to vector<8x1xf32>
    %34 = arith.mulf %32, %33 : vector<8x1xf32>
    %cst_24 = arith.constant 9.99999974E-6 : f32
    %35 = vector.broadcast %cst_24 : f32 to vector<8x1xf32>
    %36 = arith.addf %34, %35 : vector<8x1xf32>
    %37 = math.rsqrt %36 : vector<8x1xf32>
    %38 = vector.broadcast %37 : vector<8x1xf32> to vector<8x128xf32>
    %39 = arith.mulf %29, %38 : vector<8x128xf32>
    %40 = vector.broadcast %9 : vector<1x128xf32> to vector<8x128xf32>
    %41 = arith.mulf %39, %40 : vector<8x128xf32>
    %42 = vector.broadcast %10 : vector<1x128xf32> to vector<8x128xf32>
    %43 = arith.addf %41, %42 : vector<8x128xf32>
    %44 = arith.truncf %43 : vector<8x128xf32> to vector<8x128xbf16>
    %cst_25 = arith.constant dense<0.000000e+00> : vector<8x128xf32>
    %45 = tpu.matmul %44, %11, %cst_25 {dimension_numbers = #tpu.dot_dimension_numbers<[1], [0], [0], [1], [0, 0, 1, 1], [], []>} : vector<8x128xbf16>, vector<128x128xbf16>, vector<8x128xf32> -> vector<8x128xf32>
    %46 = vector.broadcast %12 : vector<1x128xf32> to vector<8x128xf32>
    %47 = arith.addf %45, %46 : vector<8x128xf32>
    %c0_26 = arith.constant 0 : index
    %c0_27 = arith.constant 0 : index
    %48 = vector.load %arg10[%c0_26, %c0_27] : memref<8x128xf32, #tpu.memory_space<vmem>>, vector<8x128xf32>
    tpu.vector_store %arg10[%c0_26, %c0_27], %47 {strides = array<i32>} : memref<8x128xf32, #tpu.memory_space<vmem>>, vector<8x128xf32>,
    return
  }
  func.func @transform_0(%arg0: i32) -> (i32, i32) {
    %c0_i32 = arith.constant 0 : i32
    %c0_i32_0 = arith.constant 0 : i32
    %c0_i32_1 = arith.constant 0 : i32
    return %c0_i32, %c0_i32_0 : i32, i32
  }
  func.func @transform_1(%arg0: i32) -> (i32, i32) {
    %c0_i32 = arith.constant 0 : i32
    %c0_i32_0 = arith.constant 0 : i32
    %c0_i32_1 = arith.constant 0 : i32
    return %c0_i32, %c0_i32_0 : i32, i32
  }
  func.func @transform_2(%arg0: i32) -> (i32, i32) {
    %c0_i32 = arith.constant 0 : i32
    %c0_i32_0 = arith.constant 0 : i32
    %c0_i32_1 = arith.constant 0 : i32
    return %c0_i32, %c0_i32_0 : i32, i32
  }
  func.func @transform_3(%arg0: i32) -> (i32, i32) {
    %c0_i32 = arith.constant 0 : i32
    %c0_i32_0 = arith.constant 0 : i32
    %c0_i32_1 = arith.constant 0 : i32
    return %c0_i32, %c0_i32_0 : i32, i32
  }
  func.func @transform_4(%arg0: i32) -> (i32, i32) {
    %c0_i32 = arith.constant 0 : i32
    %c0_i32_0 = arith.constant 0 : i32
    %c0_i32_1 = arith.constant 0 : i32
    return %c0_i32, %c0_i32_0 : i32, i32
  }
  func.func @transform_5(%arg0: i32) -> (i32, i32) {
    %c0_i32 = arith.constant 0 : i32
    %c0_i32_0 = arith.constant 0 : i32
    %c0_i32_1 = arith.constant 0 : i32
    return %c0_i32, %c0_i32_0 : i32, i32
  }
  func.func @transform_6(%arg0: i32) -> (i32, i32) {
    %c0_i32 = arith.constant 0 : i32
    %c0_i32_0 = arith.constant 0 : i32
    %c0_i32_1 = arith.constant 0 : i32
    return %c0_i32, %c0_i32_0 : i32, i32
  }
  func.func @transform_7(%arg0: i32) -> (i32, i32) {
    %c0_i32 = arith.constant 0 : i32
    %c0_i32_0 = arith.constant 0 : i32
    %c0_i32_1 = arith.constant 0 : i32
    return %c0_i32, %c0_i32_0 : i32, i32
  }
  func.func @transform_8(%arg0: i32) -> (i32, i32) {
    %c0_i32 = arith.constant 0 : i32
    %c0_i32_0 = arith.constant 0 : i32
    %c0_i32_1 = arith.constant 0 : i32
    return %c0_i32, %c0_i32_0 : i32, i32
  }
  func.func @transform_9(%arg0: i32) -> (i32, i32) {
    %c0_i32 = arith.constant 0 : i32
    %c0_i32_0 = arith.constant 0 : i32
    %c0_i32_1 = arith.constant 0 : i32
    return %c0_i32, %c0_i32_0 : i32, i32
  }
}

</mosaic_0001>

<bundles_post_ra>
// kernel: _lambda_.1
= control target key start
LH: loop header
LB: loop body
LE: loop exit
PB: predicated region body
PF: predicated region fallthrough
CT: control target
= control target key end

     0   :  { %14 = vsyncpa [#allocation3], 0  ;;  %s527_s0 = inlined_call_operand.vmem [shape: f32[8,4], index: 0, kind: input, shape index: {}]   ;;  %s528_s1 = inlined_call_operand.vmem [shape: bf16[4,128], index: 1, kind: input, shape index: {}]   ;;  %s529_s2 = inlined_call_operand.vmem [shape: f32[1,128], index: 2, kind: input, shape index: {}]   ;;  %s530_s3 = inlined_call_operand.hbm [shape: bf16[128,128], index: 3, kind: input, shape index: {}]   ;;  %s531_s4 = inlined_call_operand.vmem [shape: f32[1,128], index: 4, kind: input, shape index: {}]   ;;  %s532_s5 = inlined_call_operand.vmem [shape: f32[1,128], index: 5, kind: input, shape index: {}]   ;;  %s533_s6 = inlined_call_operand.vmem [shape: f32[1,128], index: 6, kind: input, shape index: {}]   ;;  %s534_s7 = inlined_call_operand.hbm [shape: bf16[128,128], index: 7, kind: input, shape index: {}]   ;;  %s535_s8 = inlined_call_operand.vmem [shape: f32[1,128], index: 8, kind: input, shape index: {}]   ;;  %s536_s9 = inlined_call_operand.vmem [shape: f32[8,128], index: 9, kind: output, shape index: {}]  }
   0x1   :  { %s26_s11 = sshll.u32 %s530_s3, 4  ;;  %s27_s11 = int_to_ptr.hbm [resolvable:$true] %s26_s11 }
   0x2   :  { %15 = vsyncpa [#allocation5], 0  ;;  %s443_s12 = smov [#allocation2]   ;;  %s45_s16 = sshll.u32 %s534_s7, 4  ;;  %s46_s16 = int_to_ptr.hbm [resolvable:$true] %s45_s16 }
   0x3   :  { %s28_s13 = sshll.u32 %s443_s12, 4  ;;  %s444_s17 = smov 64   ;;  %s29_s13 = int_to_ptr.vmem [resolvable:$true] %s28_s13 }
   0x4   :  { %s445_s18 = smov 4   ;;  %s446_s19 = smov [#allocation4]  }
   0x5   :  { %34 = dma.hbm_to_vmem [thread:$0]  %s27_s11, 1024, %s29_s13, [#allocation3], %s444_s17, %s444_s17, %s445_s18  }
   0x6   :  { %s47_s20 = sshll.u32 %s446_s19, 4  ;;  %s48_s20 = int_to_ptr.vmem [resolvable:$true] %s47_s20 }
   0x7   :  { %53 = dma.hbm_to_vmem [thread:$0]  %s46_s16, 1024, %s48_s20, [#allocation5], %s444_s17, %s444_s17, %s445_s18  }
   0x8   :  { %439 = dma.done.wait [#allocation3], 1024  }
   0x9   :  { %440 = vsyncadd [#allocation3], 4294966272 }
   0xa   :  { %441 = dma.done.wait [#allocation5], 1024  }
   0xb   :  { %442 = vsyncadd [#allocation5], 4294966272  ;;  %vm76_vm0 = vcmask 1041408   ;;  %v67_v0 = vld [vmem:[%s528_s1] sm:$0x3]  ;;  %v371_v2 = vld [vmem:[#allocation2 + $0x38] sm:$0xff]  ;;  %v198_v23 = vlaneseq }
   0xc   :  { %v65_v1 = vld [vmem:[%s527_s0] sm:$0xff]  ;;  %v78_v3 = vsel %vm76_vm0, %v67_v0, 0  ;;  %vm72_vm1 = vcmask 31744   ;;  %181 = vmatpush.bf16.msra.mxu1 %v371_v2  ;;  %v370_v5 = vld [vmem:[#allocation2 + $0x30] sm:$0xff]  ;;  %v369_v6 = vld [vmem:[#allocation2 + $0x28] sm:$0xff] }
   0xd   :  { %v66_v4 = vpack.c.bf16 %v65_v1, %v65_v1  ;;  %87 = vmatpush.bf16.msra.mxu0 %v78_v3  ;;  %v368_v7 = vld [vmem:[#allocation2 + $0x20] sm:$0xff]  ;;  %v367_v8 = vld [vmem:[#allocation2 + $0x18] sm:$0xff]  ;;  %v366_v9 = vld [vmem:[#allocation2 + $0x10] sm:$0xff]  ;;  %v199_v24 = vand.u32 127, %v198_v23 }
   0xe   :  { %v365_v10 = vld [vmem:[#allocation2 + $0x8] sm:$0xff]  ;;  %v364_v11 = vld [vmem:[#allocation2] sm:$0xff]  ;;  %v379_v22 = vld [vmem:[#allocation4 + $0x38] sm:$0xff] }
   0xf   :  { %v384_v12 = vld [vmem:[%s529_s2] ss:$0 sm:$0xff]  ;;  %279 = vmatpush.bf16.msra.mxu2 %v379_v22  ;;  %vm200_vm2 = vcmp.lt.s32.totalorder %v199_v24, 32  ;;  %v378_v30 = vld [vmem:[#allocation4 + $0x30] sm:$0xff]  ;;  %v377_v31 = vld [vmem:[#allocation4 + $0x28] sm:$0xff] }
  0x10   :  { %299 = vmatmul.msk.bf16.vlgmr.msra.gmra.mxu0 %vm72_vm1, %v66_v4  ;;  %182 = vmatpush.bf16.msra.mxu1 %v370_v5  ;;  %v385_v17 = vld [vmem:[%s531_s4] ss:$0 sm:$0xff]  ;;  %v375_v33 = vld [vmem:[#allocation4 + $0x18] sm:$0xff]  ;;  %v374_v34 = vld [vmem:[#allocation4 + $0x10] sm:$0xff] }
  0x11   :  { %v376_v32 = vld [vmem:[#allocation4 + $0x20] sm:$0xff]  ;;  %v373_v35 = vld [vmem:[#allocation4 + $0x8] sm:$0xff] }
  0x12   :  { %v372_v36 = vld [vmem:[#allocation4] sm:$0xff] }
  0x13   :  { %280 = vmatpush.bf16.msra.mxu2 %v378_v30  ;;  %v386_v46 = vld [vmem:[%s532_s5] ss:$0 sm:$0xff] }
  0x14   :  { %183 = vmatpush.bf16.msra.mxu1 %v369_v6  ;;  %v387_v49 = vld [vmem:[%s533_s6] ss:$0 sm:$0xff] }
  0x15   :  { %v388_v53 = vld [vmem:[%s535_s8] ss:$0 sm:$0xff] }
  0x17   :  { %281 = vmatpush.bf16.msra.mxu2 %v377_v31 }
  0x18   :  { %184 = vmatpush.bf16.msra.mxu1 %v368_v7 }
  0x1b   :  { %282 = vmatpush.bf16.msra.mxu2 %v376_v32 }
  0x1c   :  { %185 = vmatpush.bf16.msra.mxu1 %v367_v8 }
  0x1f   :  { %283 = vmatpush.bf16.msra.mxu2 %v375_v33 }
  0x20   :  { %186 = vmatpush.bf16.msra.mxu1 %v366_v9 }
  0x23   :  { %284 = vmatpush.bf16.msra.mxu2 %v374_v34 }
  0x24   :  { %187 = vmatpush.bf16.msra.mxu1 %v365_v10 }
  0x27   :  { %285 = vmatpush.bf16.msra.mxu2 %v373_v35 }
  0x28   :  { %188 = vmatpush.bf16.msra.mxu1 %v364_v11 }
  0x2b   :  { %286 = vmatpush.bf16.msra.mxu2 %v372_v36 }
  0x8d   :  { %v89_v13 = vpop.f32.mrf.mxu0 }
  0x8e   :  { %v90_v14 = vadd.f32 %v384_v12, %v89_v13 }
  0x90   :  { %v129_v15 = vpack.c.bf16 %v90_v14, %v90_v14 }
  0x92   :  { %189 = vmatmul.bf16.vlgmr.msra.gmra.mxu1 %v129_v15 }
  0x95   :  { %v91_v16 = vpop.f32.mrf.mxu0 }
 0x10f   :  { %v190_v18 = vpop.f32.mrf.mxu1 }
 0x110   :  { %v191_v19 = vadd.f32 %v385_v17, %v190_v18 }
 0x112   :  { %v194_v20 = vmax.f32 %v191_v19, 0.0 }
 0x114   :  { %195 = vadd.xlane.f32.xlu0 %v194_v20 }
 0x117   :  { %v192_v21 = vpop.f32.mrf.mxu1 }
 0x187   :  { %v196_v25 = vpop.xlane.xlu0 %195 }
 0x188   :  { %v197_v26 = vmul.f32 0.03125, %v196_v25 }
 0x18a   :  { %v201_v27 = vsub.f32 %v194_v20, %v197_v26 }
 0x18c   :  { %v202_v28 = vsel %vm200_vm2, %v201_v27, 0.0 }
 0x18d   :  { %v203_v29 = vmul.f32 %v202_v28, %v202_v28 }
 0x18f   :  { %204 = vadd.xlane.f32.xlu0 %v203_v29 }
 0x202   :  { %v205_v37 = vpop.xlane.xlu0 %204 }
 0x203   :  { %v206_v38 = vmul.f32 0.03125, %v205_v37 }
 0x205   :  { %v207_v39 = vadd.f32 1e-05, %v206_v38 }
 0x207   :  { %389 = vrsqrt.f32 %v207_v39  ;;  %vm214_vm4 = vweird.f32 %v207_v39 }
 0x20d   :  { %v390_v40 = vpop.eup %389 }
 0x20e   :  { %v209_v41 = vmul.f32 %v390_v40, %v207_v39  ;;  %vm215_vm3 = vweird.f32 %v390_v40 }
 0x20f   :  { %vm216_vm5 = vmor %vm214_vm4, %vm215_vm3 }
 0x210   :  { %v210_v42 = vmul.f32 %v390_v40, %v209_v41 }
 0x212   :  { %v211_v43 = vmul.f32 0.5, %v210_v42 }
 0x214   :  { %v212_v44 = vsub.f32 1.5, %v211_v43 }
 0x216   :  { %v213_v45 = vmul.f32 %v390_v40, %v212_v44 }
 0x218   :  { %v217_v47 = vsel %vm216_vm5, %v390_v40, %v213_v45 }
 0x219   :  { %v218_v48 = vmul.f32 %v217_v47, %v202_v28 }
 0x21b   :  { %v222_v50 = vmul.f32 %v386_v46, %v218_v48 }
 0x21d   :  { %v226_v51 = vadd.f32 %v387_v49, %v222_v50 }
 0x21f   :  { %v227_v52 = vpack.c.bf16 %v226_v51, %v226_v51 }
 0x221   :  { %287 = vmatmul.bf16.vlgmr.msra.gmra.mxu2 %v227_v52 }
 0x2a4   :  { %v288_v54 = vpop.f32.mrf.mxu2 }
 0x2a5   :  { %v289_v55 = vadd.f32 %v388_v53, %v288_v54 }
 0x2a7   :  { %292 = vst [vmem:[%s536_s9] sm:$0xff] %v289_v55 }
 0x2ac   :  { %v290_v56 = vpop.f32.mrf.mxu2 }
 0x2ad   :  { %297 = vsyncpa [#allocation3], 1 }
 0x2ae   :  { %298 = vsyncpa [#allocation5], 1 }

</bundles_post_ra>
